<compile_context>
chip_gen: v5e
topology: v5e:2x2
jax: 0.10.0
libtpu: 0.0.40
codegen_flags: <defaults>
</compile_context>

<pallas_src>
import functools

import jax
import jax.numpy as jnp
from jax import lax
from jax.experimental import pallas as pl
from jax.experimental.pallas import tpu as pltpu

_LANE = 128
_SUBLANE = 8
_MAX_LANE_TILES = 16                  # lane tile cap (x dtype-width factor)
_FUSED_BLOCK_ELEMS = 1_572_864        # ~6 MiB f32 per fused block
_STREAM_BLOCK_ELEMS = 2_097_152       # ~8 MiB f32 per streaming block
_VMEM_LIMIT_BYTES = 48 * 1024 * 1024  # fits v7x's 64 MiB physical VMEM


# --------------------------------------------------------------------------
# Kernels
# --------------------------------------------------------------------------
def _fused_kernel(x_ref, w1_ref, b1_ref, w2_ref, b2_ref, o_ref):
    """Single pass: pool + excitation MLP + scale/shift on one resident tile.

    x_ref/o_ref: (nb, C, HW) block — whole batches, full spatial extent.
    w1: (C, S), b1: (1, S), w2: (S, 2C), b2: (1, 2C) live untiled in VMEM.
    Partial batch blocks at the grid boundary are safe: every op is
    row-independent across batches, and out-of-bounds rows are never written.
    """
    nb, c, hw = x_ref.shape
    x = x_ref[...].astype(jnp.float32)

    # Squeeze: per-(batch, channel) spatial mean.
    pooled = jnp.sum(x, axis=2) * (1.0 / hw)                        # (nb, C)

    # Excitation MLP (tiny MXU matmuls + EUP exp; hidden under the DMAs).
    w1 = w1_ref[...].astype(jnp.float32)
    b1 = b1_ref[...].astype(jnp.float32)
    w2 = w2_ref[...].astype(jnp.float32)
    b2 = b2_ref[...].astype(jnp.float32)
    h = jnp.maximum(
        jnp.dot(pooled, w1, preferred_element_type=jnp.float32) + b1, 0.0)
    y = jnp.dot(h, w2, preferred_element_type=jnp.float32) + b2     # (nb, 2C)
    scale = 1.0 / (1.0 + jnp.exp(-y[:, :c]))                        # sigmoid
    shift = y[:, c:]

    # Scale + shift, broadcast along the lane (spatial) axis; f32 FMA, single
    # cast on the store.
    o_ref[...] = (x * scale[:, :, None] + shift[:, :, None]).astype(o_ref.dtype)


def _pool_sum_kernel(x_ref, o_ref, acc_ref, *, hw):
    """Row sums of the unpadded [rows, hw] view, tiled (TR, THW).

    Grid axis 1 is the spatial reduction.  Per-lane partials accumulate in a
    lane-dense (TR, <=128) f32 scratch; the cross-lane reduce and the (TR, 1)
    store happen only on the last spatial step.  Tail columns past the true hw
    are masked, so boundary-block garbage never enters the sum.
    """
    j = pl.program_id(1)

    @pl.when(j == 0)
    def _():
        acc_ref[...] = jnp.zeros_like(acc_ref)

    tr, thw = x_ref.shape
    x = x_ref[...].astype(jnp.float32)
    if hw % thw:
        col = lax.broadcasted_iota(jnp.int32, (tr, thw), 1) + j * thw
        x = jnp.where(col < hw, x, 0.0)

    acc_w = acc_ref.shape[1]
    part = x[:, 0:acc_w]
    for cstart in range(acc_w, thw, acc_w):
        part = part + x[:, cstart:cstart + acc_w]
    acc_ref[...] += part

    @pl.when(j == pl.num_programs(1) - 1)
    def _():
        o_ref[...] = jnp.sum(acc_ref[...], axis=1, keepdims=True)


def _apply_kernel(x_ref, s_ref, t_ref, o_ref):
    """Streaming o = x * scale + shift.  scale/shift are (TR, 1) float32 row
    vectors broadcast along the lane axis; FMA in f32, cast only on the store."""
    o_ref[...] = (x_ref[...].astype(jnp.float32) * s_ref[...]
                  + t_ref[...]).astype(o_ref.dtype)


# --------------------------------------------------------------------------
# Tiling
# --------------------------------------------------------------------------
def _choose_tiles(rows, hw, itemsize):
    """(TR, THW) for the two-pass [rows, hw] streaming path.

    THW: multiple of 128 (or the full extent when hw < 128), wider for narrow
         dtypes; capped so the in-kernel chunk loop stays short.
    TR:  multiple of 8 sublanes, snapped to the dtype packing multiple (16 for
         16-bit, 32 for 8-bit) when enough rows exist, never exceeding the
         array, and kept to >= 2 row blocks when possible (v7x has 2 TCs).
    """
    rmul = _SUBLANE * max(1, 4 // itemsize)

    if hw < _LANE:
        thw = hw
    else:
        max_lane_tiles = _MAX_LANE_TILES * max(1, 4 // itemsize)
        thw = min(hw // _LANE, max_lane_tiles) * _LANE

    if rows <= _SUBLANE:
        tr = min(rows, _SUBLANE)
    else:
        max_rows = (rows // _SUBLANE) * _SUBLANE
        budget_rows = max(
            _SUBLANE,
            (_STREAM_BLOCK_ELEMS // thw) // _SUBLANE * _SUBLANE)
        tr = min(max_rows, budget_rows)
        if max_rows >= 2 * _SUBLANE:
            tr = min(tr, max(_SUBLANE, pl.cdiv(rows, 2 * _SUBLANE) * _SUBLANE))
        if tr >= rmul:
            tr = (tr // rmul) * rmul
    return tr, thw


# --------------------------------------------------------------------------
# Wrapper
# --------------------------------------------------------------------------
def se_block(x, w1, b1, w2, b2, *, force_two_pass=False):
    """SE block forward: out = x * sigmoid(w) + b, with
    [w | b] = Linear(ReLU(Linear(mean_hw(x)))).

    x: [B, C, H, W]. Linear weights are pre-transposed: w1 [C, S], b1 [1, S],
    w2 [S, 2C], b2 [1, 2C]."""
    B, C, H, W = x.shape
    HW = H * W
    R = B * C
    itemsize = jnp.dtype(x.dtype).itemsize
    x3 = x.reshape(B, C, HW)  # free reshape (merges trailing dims)

    # ---- Fused single pass: whole batches, full spatial extent per block. ----
    batch_elems = C * HW
    if not force_two_pass and batch_elems <= _FUSED_BLOCK_ELEMS:
        nb = max(1, _FUSED_BLOCK_ELEMS // batch_elems)
        if B >= 2:
            nb = min(nb, pl.cdiv(B, 2))   # >= 2 blocks so both v7x TCs get work
        nb = min(nb, B)
        out3 = pl.pallas_call(
            _fused_kernel,
            out_shape=jax.ShapeDtypeStruct((B, C, HW), x.dtype),
            grid_spec=pltpu.PrefetchScalarGridSpec(
                num_scalar_prefetch=0,
                grid=(pl.cdiv(B, nb),),
                in_specs=[
                    pl.BlockSpec((nb, C, HW), lambda i: (i, 0, 0)),
                    pl.BlockSpec(w1.shape, lambda i: (0, 0)),
                    pl.BlockSpec(b1.shape, lambda i: (0, 0)),
                    pl.BlockSpec(w2.shape, lambda i: (0, 0)),
                    pl.BlockSpec(b2.shape, lambda i: (0, 0)),
                ],
                out_specs=pl.BlockSpec((nb, C, HW), lambda i: (i, 0, 0)),
            ),
            compiler_params=pltpu.CompilerParams(
                dimension_semantics=("parallel",),
                vmem_limit_bytes=_VMEM_LIMIT_BYTES,
            ),
            cost_estimate=pl.CostEstimate(
                flops=3 * B * C * HW,
                transcendentals=B * C,
                bytes_accessed=2 * B * C * HW * itemsize,
            ),
        )(x3, w1, b1, w2, b2)
        return out3.reshape(B, C, H, W)

    # ---- Two-pass streaming fallback (very large C*H*W). ----
    x2 = x3.reshape(R, HW)
    TR, THW = _choose_tiles(R, HW, itemsize)
    grid = (pl.cdiv(R, TR), pl.cdiv(HW, THW))

    # Pass 1: row sums over the spatial axis (unpadded; tail columns masked).
    sums = pl.pallas_call(
        functools.partial(_pool_sum_kernel, hw=HW),
        out_shape=jax.ShapeDtypeStruct((R, 1), jnp.float32),
        grid_spec=pltpu.PrefetchScalarGridSpec(
            num_scalar_prefetch=0,
            grid=grid,
            in_specs=[pl.BlockSpec((TR, THW), lambda i, j: (i, j))],
            out_specs=pl.BlockSpec((TR, 1), lambda i, j: (i, 0)),
            scratch_shapes=[pltpu.VMEM((TR, min(THW, _LANE)), jnp.float32)],
        ),
        compiler_params=pltpu.CompilerParams(
            dimension_semantics=("parallel", "arbitrary"),
            vmem_limit_bytes=_VMEM_LIMIT_BYTES,
        ),
        cost_estimate=pl.CostEstimate(
            flops=R * HW,
            transcendentals=0,
            bytes_accessed=R * HW * itemsize + R * 4,
        ),
    )(x2)

    # Excitation MLP: tiny (B x C x S) work, hoisted out of the grid loop and
    # batched over B in plain XLA.  scale/shift stay float32 into pass 2.
    pooled = (sums[:, 0] * (1.0 / HW)).reshape(B, C)
    h = jnp.maximum(pooled @ w1.astype(jnp.float32) + b1.astype(jnp.float32), 0.0)
    y = h @ w2.astype(jnp.float32) + b2.astype(jnp.float32)
    scale = jax.nn.sigmoid(y[:, :C]).reshape(R, 1)
    shift = y[:, C:].reshape(R, 1)

    # Pass 2: streaming o = x * scale + shift (both grid axes parallel).
    out2 = pl.pallas_call(
        _apply_kernel,
        out_shape=jax.ShapeDtypeStruct((R, HW), x.dtype),
        grid_spec=pltpu.PrefetchScalarGridSpec(
            num_scalar_prefetch=0,
            grid=grid,
            in_specs=[
                pl.BlockSpec((TR, THW), lambda i, j: (i, j)),
                pl.BlockSpec((TR, 1), lambda i, j: (i, 0)),
                pl.BlockSpec((TR, 1), lambda i, j: (i, 0)),
            ],
            out_specs=pl.BlockSpec((TR, THW), lambda i, j: (i, j)),
        ),
        compiler_params=pltpu.CompilerParams(
            dimension_semantics=("parallel", "parallel"),
            vmem_limit_bytes=_VMEM_LIMIT_BYTES,
        ),
        cost_estimate=pl.CostEstimate(
            flops=2 * R * HW,
            transcendentals=0,
            bytes_accessed=2 * R * HW * itemsize + 2 * R * 4,
        ),
    )(x2, scale, shift)
    return out2.reshape(B, C, H, W)


def se_block_ref(x, w1, b1, w2, b2):
    """Pure-JAX reference mirroring the PyTorch forward (computed in f32)."""
    B, C, H, W = x.shape
    xf = x.astype(jnp.float32)
    pooled = xf.mean(axis=(2, 3))                        # (B, C)
    h = jnp.maximum(pooled @ w1 + b1, 0.0)               # (B, S)
    y = h @ w2 + b2                                      # (B, 2C)
    w = jax.nn.sigmoid(y[:, :C])[:, :, None, None]
    b = y[:, C:][:, :, None, None]
    return xf * w + b


if __name__ == "__main__":
    C, SE = 4, 8
    key = jax.random.PRNGKey(0)
    key, k1, kb1, k2, kb2 = jax.random.split(key, 5)
    # Deterministic synthetic parameters (Linear weights stored as [in, out]).
    w1 = jax.random.normal(k1, (C, SE), dtype=jnp.float32) * 0.1
    b1 = jax.random.normal(kb1, (1, SE), dtype=jnp.float32) * 0.1
    w2 = jax.random.normal(k2, (SE, 2 * C), dtype=jnp.float32) * 0.1
    b2 = jax.random.normal(kb2, (1, 2 * C), dtype=jnp.float32) * 0.1

    cases = [
        # (shape, dtype, force_two_pass, tol)
        ((2, C, 16, 16), jnp.float32, False, 1e-5),   # fused single pass
        ((2, C, 14, 14), jnp.float32, True, 1e-5),    # two-pass, unaligned H*W
        ((2, C, 14, 14), jnp.bfloat16, True, 2e-2),   # bf16 packing + masking
    ]
    for shape, dtype, two_pass, tol in cases:
        key, kx = jax.random.split(key)
        x = jax.random.normal(kx, shape, dtype=jnp.float32).astype(dtype)
        out = se_block(x, w1, b1, w2, b2, force_two_pass=two_pass)
        out = jax.block_until_ready(out)
        ref = se_block_ref(x, w1, b1, w2, b2)
        assert out.shape == shape and out.dtype == dtype, (shape, dtype)
        assert jnp.allclose(out.astype(jnp.float32), ref, atol=tol, rtol=tol), (
            shape, dtype, two_pass)

    print("KERNEL_OK")
</pallas_src>

<mosaic_0001>
module attributes {stable_mosaic.version = 11 : i64} {
  func.func @_fused_kernel(%arg0: i32, %arg1: memref<1x4x256xf32, #tpu.memory_space<vmem>>, %arg2: memref<4x8xf32, #tpu.memory_space<vmem>>, %arg3: memref<1x8xf32, #tpu.memory_space<vmem>>, %arg4: memref<8x8xf32, #tpu.memory_space<vmem>>, %arg5: memref<1x8xf32, #tpu.memory_space<vmem>>, %arg6: memref<1x4x256xf32, #tpu.memory_space<vmem>>) attributes {dimension_semantics = [#tpu.dimension_semantics<parallel>], iteration_bounds = array<i64: 2>, scalar_prefetch = 0 : i64, scratch_operands = 0 : i64, tpu.core_type = #tpu.core_type<tc>, window_params = [{transform_indices = @transform_0, window_bounds = array<i64: 1, 4, 256>}, {pipeline_mode = #tpu.pipeline_mode<synchronous>, transform_indices = @transform_1, window_bounds = array<i64: 4, 8>}, {pipeline_mode = #tpu.pipeline_mode<synchronous>, transform_indices = @transform_2, window_bounds = array<i64: 1, 8>}, {pipeline_mode = #tpu.pipeline_mode<synchronous>, transform_indices = @transform_3, window_bounds = array<i64: 8, 8>}, {pipeline_mode = #tpu.pipeline_mode<synchronous>, transform_indices = @transform_4, window_bounds = array<i64: 1, 8>}, {transform_indices = @transform_5, window_bounds = array<i64: 1, 4, 256>}]} {
    %c0 = arith.constant 0 : index
    %c0_0 = arith.constant 0 : index
    %c0_1 = arith.constant 0 : index
    %0 = vector.load %arg1[%c0, %c0_0, %c0_1] : memref<1x4x256xf32, #tpu.memory_space<vmem>>, vector<1x4x256xf32>
    %cst = arith.constant dense<0.000000e+00> : vector<1x4xf32>
    %1 = vector.multi_reduction <add>, %0, %cst [2] : vector<1x4x256xf32> to vector<1x4xf32>
    %cst_2 = arith.constant 3.906250e-03 : f32
    %2 = vector.broadcast %cst_2 : f32 to vector<1x4xf32>
    %3 = arith.mulf %1, %2 : vector<1x4xf32>
    %c0_3 = arith.constant 0 : index
    %c0_4 = arith.constant 0 : index
    %4 = vector.load %arg2[%c0_3, %c0_4] : memref<4x8xf32, #tpu.memory_space<vmem>>, vector<4x8xf32>
    %c0_5 = arith.constant 0 : index
    %c0_6 = arith.constant 0 : index
    %5 = vector.load %arg3[%c0_5, %c0_6] : memref<1x8xf32, #tpu.memory_space<vmem>>, vector<1x8xf32>
    %c0_7 = arith.constant 0 : index
    %c0_8 = arith.constant 0 : index
    %6 = vector.load %arg4[%c0_7, %c0_8] : memref<8x8xf32, #tpu.memory_space<vmem>>, vector<8x8xf32>
    %c0_9 = arith.constant 0 : index
    %c0_10 = arith.constant 0 : index
    %7 = vector.load %arg5[%c0_9, %c0_10] : memref<1x8xf32, #tpu.memory_space<vmem>>, vector<1x8xf32>
    %cst_11 = arith.constant dense<0.000000e+00> : vector<1x8xf32>
    %8 = tpu.matmul %3, %4, %cst_11 {dimension_numbers = #tpu.dot_dimension_numbers<[1], [0], [0], [1], [0, 0, 1, 1], [], []>} : vector<1x4xf32>, vector<4x8xf32>, vector<1x8xf32> -> vector<1x8xf32>
    %9 = arith.addf %8, %5 : vector<1x8xf32>
    %cst_12 = arith.constant 0.000000e+00 : f32
    %10 = vector.broadcast %cst_12 : f32 to vector<1x8xf32>
    %11 = arith.maximumf %9, %10 : vector<1x8xf32>
    %cst_13 = arith.constant dense<0.000000e+00> : vector<1x8xf32>
    %12 = tpu.matmul %11, %6, %cst_13 {dimension_numbers = #tpu.dot_dimension_numbers<[1], [0], [0], [1], [0, 0, 1, 1], [], []>} : vector<1x8xf32>, vector<8x8xf32>, vector<1x8xf32> -> vector<1x8xf32>
    %13 = arith.addf %12, %7 : vector<1x8xf32>
    %14 = vector.extract_strided_slice %13 {offsets = [0, 0], sizes = [1, 4], strides = [1, 1]} : vector<1x8xf32> to vector<1x4xf32>
    %cst_14 = arith.constant 0.000000e+00 : f32
    %15 = vector.broadcast %cst_14 : f32 to vector<1x4xf32>
    %16 = arith.subf %15, %14 : vector<1x4xf32>
    %17 = math.exp %16 : vector<1x4xf32>
    %cst_15 = arith.constant 1.000000e+00 : f32
    %18 = vector.broadcast %cst_15 : f32 to vector<1x4xf32>
    %19 = arith.addf %18, %17 : vector<1x4xf32>
    %cst_16 = arith.constant 1.000000e+00 : f32
    %20 = vector.broadcast %cst_16 : f32 to vector<1x4xf32>
    %21 = arith.divf %20, %19 : vector<1x4xf32>
    %22 = vector.extract_strided_slice %13 {offsets = [0, 4], sizes = [1, 4], strides = [1, 1]} : vector<1x8xf32> to vector<1x4xf32>
    %23 = vector.shape_cast %21 : vector<1x4xf32> to vector<1x4x1xf32>
    %24 = vector.broadcast %23 : vector<1x4x1xf32> to vector<1x4x256xf32>
    %25 = arith.mulf %0, %24 : vector<1x4x256xf32>
    %26 = vector.shape_cast %22 : vector<1x4xf32> to vector<1x4x1xf32>
    %27 = vector.broadcast %26 : vector<1x4x1xf32> to vector<1x4x256xf32>
    %28 = arith.addf %25, %27 : vector<1x4x256xf32>
    %c0_17 = arith.constant 0 : index
    %c0_18 = arith.constant 0 : index
    %c0_19 = arith.constant 0 : index
    %29 = vector.load %arg6[%c0_17, %c0_18, %c0_19] : memref<1x4x256xf32, #tpu.memory_space<vmem>>, vector<1x4x256xf32>
    tpu.vector_store %arg6[%c0_17, %c0_18, %c0_19], %28 {strides = array<i32>} : memref<1x4x256xf32, #tpu.memory_space<vmem>>, vector<1x4x256xf32>,
    return
  }
  func.func @transform_0(%arg0: i32) -> (i32, i32, i32) {
    %c0_i32 = arith.constant 0 : i32
    %c0_i32_0 = arith.constant 0 : i32
    %c0_i32_1 = arith.constant 0 : i32
    return %arg0, %c0_i32, %c0_i32_0 : i32, i32, i32
  }
  func.func @transform_1(%arg0: i32) -> (i32, i32) {
    %c0_i32 = arith.constant 0 : i32
    %c0_i32_0 = arith.constant 0 : i32
    %c0_i32_1 = arith.constant 0 : i32
    return %c0_i32, %c0_i32_0 : i32, i32
  }
  func.func @transform_2(%arg0: i32) -> (i32, i32) {
    %c0_i32 = arith.constant 0 : i32
    %c0_i32_0 = arith.constant 0 : i32
    %c0_i32_1 = arith.constant 0 : i32
    return %c0_i32, %c0_i32_0 : i32, i32
  }
  func.func @transform_3(%arg0: i32) -> (i32, i32) {
    %c0_i32 = arith.constant 0 : i32
    %c0_i32_0 = arith.constant 0 : i32
    %c0_i32_1 = arith.constant 0 : i32
    return %c0_i32, %c0_i32_0 : i32, i32
  }
  func.func @transform_4(%arg0: i32) -> (i32, i32) {
    %c0_i32 = arith.constant 0 : i32
    %c0_i32_0 = arith.constant 0 : i32
    %c0_i32_1 = arith.constant 0 : i32
    return %c0_i32, %c0_i32_0 : i32, i32
  }
  func.func @transform_5(%arg0: i32) -> (i32, i32, i32) {
    %c0_i32 = arith.constant 0 : i32
    %c0_i32_0 = arith.constant 0 : i32
    %c0_i32_1 = arith.constant 0 : i32
    return %arg0, %c0_i32, %c0_i32_0 : i32, i32, i32
  }
}

</mosaic_0001>

<bundles_post_ra>
// kernel: tpu_custom_call.1
= control target key start
LH: loop header
LB: loop body
LE: loop exit
PB: predicated region body
PF: predicated region fallthrough
CT: control target
= control target key end

     0   :  { %10 = vsyncpa [#allocation3], 0  ;;  %s947_s0 = inlined_call_operand.hbm [shape: f32[2,4,256], index: 0, kind: input, shape index: {}]   ;;  %s948_s1 = inlined_call_operand.hbm [shape: f32[4,8], index: 1, kind: input, shape index: {}]   ;;  %s949_s2 = inlined_call_operand.vmem [shape: f32[1,8], index: 2, kind: input, shape index: {}]   ;;  %s950_s3 = inlined_call_operand.hbm [shape: f32[8,8], index: 3, kind: input, shape index: {}]   ;;  %s951_s4 = inlined_call_operand.vmem [shape: f32[1,8], index: 4, kind: input, shape index: {}]   ;;  %s952_s5 = inlined_call_operand.hbm [shape: f32[2,4,256], index: 5, kind: output, shape index: {}]  }
   0x1   :  { %12 = vsyncpa [#allocation3 + $0x1], 0 }
   0x2   :  { %13 = vsyncpa [#allocation6], 0 }
   0x3   :  { %14 = vsyncpa [#allocation4], 0 }
   0x4   :  { %16 = vsyncpa [#allocation4 + $0x1], 0  ;;  %s792_s18 = smov 0   ;;  %s794_s19 = smov 0  }
   0x5   :  { %s796_s20 = smov 0   ;;  %s798_s21 = smov 0  }
   0x6 LB: > { %s813_s22 = sadd.s32 4294967295, %s757_s21   ;;  %s499_s23 = sadd.s32 4294967294, %s757_s21   ;;  %s757_s21 = sphi %s798_s21, %s962_s21   ;;  %s753_s20 = sphi %s796_s20, %s961_s20   ;;  %s749_s19 = sphi %s794_s19, %s960_s19   ;;  %s745_s18 = sphi %s792_s18, %s959_s18  }
   0x7   : > { %p42_p0 = scmp.ne.s32.totalorder %s749_s19, %s745_s18  ;;  %p43_p1 = scmp.eq.s32.totalorder %s813_s22, 0 }
   0x8   : > { %p150_p2 = scmp.eq.s32.totalorder %s813_s22, 1  ;;  %p156_p3 = scmp.eq.s32.totalorder %s499_s23, 1 }
   0x9   : > { %p822_p4 = por %p43_p1, %p42_p0  ;;  %p500_p5 = scmp.ge.s32.totalorder %s757_s21, 1 }
   0xa   : > { %p827_p6 = por %p156_p3, %p42_p0  ;;  %p163_p7 = scmp.lt.s32.totalorder %s757_s21, 3 }
   0xb   : > { %s175_s28 = sshll.u32 %s948_s1, 4  ;;  %s759_s30 = smov [#allocation5]   ;;  %s176_s28 = int_to_ptr.hbm [resolvable:$true] %s175_s28 }
   0xc   : > { %p835_p8 = pnand %p500_p5, %p163_p7  ;;  %s177_s6 = sshll.u32 %s759_s30, 4  ;;  %s178_s6 = int_to_ptr.vmem [resolvable:$true] %s177_s6 }
   0xd   : > { %s190_s9 = sshll.u32 %s950_s3, 4  ;;  %s760_s10 = smov [#allocation7]   ;;  %s191_s9 = int_to_ptr.hbm [resolvable:$true] %s190_s9 }
   0xe   : > { %p534_p10 = pneg %p835_p8  ;;  %s192_s11 = sshll.u32 %s760_s10, 4  ;;  %s193_s11 = int_to_ptr.vmem [resolvable:$true] %s192_s11 }
   0xf   : > { %s848_s12 = sadd.s32 1, %s757_s21   ;;  %s29_s13 = sadd.s32 1, %s753_s20 }
  0x10   : > { %p535_p11 = pnand %p534_p10, %p43_p1  ;;  %s26_s14 = ssub.s32 %s757_s21, %s848_s12 }
  0x11   : > { %p36_p12 = scmp.ne.s32.totalorder %s753_s20, %s749_s19  ;;  %p27_p13 = scmp.eq.s32.totalorder %s26_s14, 0 }
  0x12   : > { %537 = dma.hbm_to_vmem [thread:$0]  (!%p535_p11), %s176_s28, 64, %s178_s6, [#allocation6]  }
  0x13   : > { %540 = dma.hbm_to_vmem [thread:$0]  (!%p535_p11), %s191_s9, 128, %s193_s11, [#allocation6]  }
  0x14   : > { %p37_p0 = scmp.eq.s32.totalorder %s757_s21, 0  ;;  %p858_p3 = por %p150_p2, %p36_p12 }
  0x15   : > { %p551_p5 = scmp.lt.s32.totalorder %s757_s21, 2  ;;  %s206_s17 = sand.u32 1, %s753_s20  }
  0x16   : > { %s864_s16 = scalar_select %p27_p13, %s753_s20, %s29_s13  }
  0x17   : > { %p38_p7 = por %p37_p0, %p36_p12  ;;  %s504_s23 = sshll.u32 %s206_s17, 3 }
  0x18   : > { %s520_s26 = sshll.u32 %s757_s21, 3  ;;  %s210_s6 = scalar_lea.vmem [#allocation2], %s504_s23 }
  0x19   : > { %s215_s30 = scalar_lea.hbm %s947_s0, %s520_s26  ;;  %s219_s7 = sshll.u32 %s210_s6, 4  ;;  %s220_s7 = int_to_ptr.vmem [resolvable:$true] %s219_s7 }
  0x1a   : > { %s217_s8 = sshll.u32 %s215_s30, 4  ;;  %p871_p2 = pnand %p551_p5, %p38_p7  ;;  %s218_s8 = int_to_ptr.hbm [resolvable:$true] %s217_s8 }
  0x1b   : > { %s207_s10 = scalar_lea.sflag [#allocation3], %s206_s17  ;;  %s657_s11 = sshra.s32 %s218_s8, 4  ;;  %s658_s11 = int_to_ptr.hbm [resolvable:$true] %s657_s11 }
  0x1c   : > { %s659_s13 = scalar_lea.hbm %s658_s11, 8  ;;  %p661_p11 = pneg %p871_p2 }
  0x1d   : > { %p660_p10 = scmp.ne.s32.totalorder %s658_s11, %s659_s13  ;;  %s664_s26 = scalar_lea.hbm %s947_s0, 16 }
  0x1e   : > { %p665_p0 = scmp.lt.s32.totalorder %s658_s11, %s947_s0  ;;  %p666_p5 = scmp.lt.s32.totalorder %s664_s26, %s659_s13 }
  0x1f   : > { %p662_p12 = pnand %p661_p11, %p660_p10 }
  0x20   : > { %p667_p7 = por %p666_p5, %p665_p0 }
  0x21   : > { %p663_p13 = pneg %p662_p12 }
  0x23   : > { %p668_p9 = pnand %p667_p7, %p663_p13 }
  0x25   : > { %671 = shalt.err (!%p668_p9)
}
  0x26   : > { %544 = dma.hbm_to_vmem [thread:$0]  (!%p871_p2), %s218_s8, 128, %s220_s7, %s207_s10  }
  0x27   : > { %228 = sbr.rel (%p835_p8) target bundleno = 593 (0x251), region = 40  ;;  %s888_s17 = sand.u32 (!%p835_p8), 1, %s749_s19  }
  0x28   : > { %s508_s30 = sshll.u32 (!%p835_p8), %s888_s17, 3  ;;  %s231_s6 = scalar_lea.sflag (!%p835_p8), [#allocation3], %s888_s17 }
  0x29   : > { %s234_s11 = scalar_lea.vmem (!%p835_p8), [#allocation2], %s508_s30 }
  0x2c   : > { %732 = dma.done.wait (%p822_p4), %s231_s6, 128  }
  0x2d   : > { %734 = vsyncadd (%p822_p4), %s231_s6, 4294967168 }
  0x2e   : > { %736 = dma.done.wait (%p43_p1), [#allocation6], 192  }
  0x2f   : > { %738 = vsyncadd (%p43_p1), [#allocation6], 4294967104  ;;  %v902_v0 = vld [vmem:[%s234_s11] sm:$0xff]  ;;  %vm279_vm0 = vcmask 1043456   ;;  %v286_v6 = vld [vmem:[#allocation5] sm:$0xf]  ;;  %v291_v7 = vlaneseq }
  0x30   : > { %274 = vst [vmem:[#allocation1] ss:$2 sm:$0xff] %v902_v0  ;;  %512 = vmatpush.msk.msra.mxu0 %vm279_vm0, %v286_v6  ;;  %vm294_vm1 = vcmask 31744   ;;  %v288_v12 = vld [vmem:[#allocation7] sm:$0xff]  ;;  %vm321_vm2 = vcmask 64512   ;;  %s521_s9 = sshll.u32 %s813_s22, 3 }
  0x31   : > { %v292_v8 = vand.u32 127, %v291_v7  ;;  %340 = vmatpush.msra.mxu1 %v288_v12  ;;  %v366_v13 = vshrl.u32 %v291_v7, 7  ;;  %v287_v15 = vld [vmem:[%s949_s2] sm:$0x1]  ;;  %v761_v38 = vmov 839922192   ;;  %s405_s14 = scalar_lea.hbm %s952_s5, %s521_s9 }
  0x32   : > { %v289_v19 = vld [vmem:[%s951_s4] sm:$0x1]  ;;  %v373_v39 = vunpack.c.l.s4 %v761_v38  ;;  %s271_s23 = scalar_lea.vmem [#allocation8], %s508_s30  ;;  %s409_s27 = sshll.u32 %s405_s14, 4  ;;  %s410_s27 = int_to_ptr.hbm [resolvable:$true] %s409_s27 }
  0x33   : > { %v381_v14 = vadd.s32 4, %v366_v13  ;;  %590 = vset.pattern.permute.xlu0 %v366_v13  ;;  %s407_s26 = sshll.u32 %s271_s23, 4  ;;  %s394_s22 = scalar_lea.sflag [#allocation4], %s888_s17  ;;  %s408_s26 = int_to_ptr.vmem [resolvable:$true] %s407_s26 }
  0x34   : > { %v374_v40 = vunpack.c.0.s8 %v373_v39  ;;  %s701_s28 = sshra.s32 %s410_s27, 4  ;;  %s707_s30 = scalar_lea.hbm %s952_s5, 16  ;;  %s702_s28 = int_to_ptr.hbm [resolvable:$true] %s701_s28 }
  0x35   : > { %591 = vset.pattern.permute.xlu1 %v381_v14  ;;  %s703_s6 = scalar_lea.hbm %s702_s28, 8  ;;  %p708_p9 = scmp.lt.s32.totalorder %s702_s28, %s952_s5 }
  0x36   : > { %p704_p1 = scmp.ne.s32.totalorder %s702_s28, %s703_s6  ;;  %p709_p2 = scmp.lt.s32.totalorder %s707_s30, %s703_s6 }
  0x37   : > { %v275_v1 = vld.sshfl [vmem:[#allocation1] sm:$0xff pattern:$0x75316420]  ;;  %v276_v2 = vld.sshfl [vmem:[#allocation1 + $0x8] sm:$0xff pattern:$0x75316420] }
  0x38   : > { %v280_v3 = vsel %vm279_vm0, %v275_v1, 0.0  ;;  %v281_v4 = vsel %vm279_vm0, %v276_v2, 0.0  ;;  %p705_p4 = pnand %p704_p1, %p858_p3  ;;  %p710_p10 = por %p709_p2, %p708_p9 }
  0x39   : > { %v282_v5 = vadd.f32 %v281_v4, %v280_v3 }
  0x3a   : > { %p706_p8 = pneg %p705_p4 }
  0x3b   : > { %283 = vadd.xlane.f32.xlu0 %v282_v5 }
  0x3c   : > { %p711_p11 = pnand %p710_p10, %p706_p8 }
  0xae   : > { %v284_v9 = vpop.xlane.xlu0 %283 }
  0xaf   : > { %v285_v10 = vmul.f32 0.00390625, %v284_v9 }
  0xb1   : > { %v293_v11 = vperm.slane %v285_v10, %v292_v8 }
  0xb3   : > { %513 = vmatmul.msk.f32.vlgmr.msra.gmra.mxu0 %vm294_vm1, %v293_v11 }
 0x130   : > { %v317_v16 = vpop.f32.mrf.mxu0 }
 0x131   : > { %v318_v17 = vadd.f32 %v317_v16, %v287_v15 }
 0x133   : > { %v320_v18 = vmax.f32 %v318_v17, 0.0 }
 0x135   : > { %514 = vmatmul.msk.f32.vlgmr.msra.gmra.mxu1 %vm321_vm2, %v320_v18 }
 0x1b2   : > { %v342_v20 = vpop.f32.mrf.mxu1 }
 0x1b3   : > { %v343_v21 = vadd.f32 %v342_v20, %v289_v19 }
 0x1b5   : > { %v345_v22 = vsub.f32 0.0, %v343_v21  ;;  %v378_v23 = vperm.slane %v343_v21, 0 }
 0x1b7   : > { %v346_v24 = vmul.f32 1.442695, %v345_v22  ;;  %383 = vperm.xlu1 %591, %v378_v23  }
 0x1b9   : > { %593 = vpow2.f32 %v346_v24 }
 0x1bf   : > { %v594_v25 = vpop.eup %593 }
 0x1c0   : > { %v348_v26 = vadd.f32 1.0, %v594_v25 }
 0x1c2   : > { %595 = vrcp.f32 %v348_v26  ;;  %v360_v30 = vand.u32 2147483648, %v348_v26  ;;  %v358_v32 = vand.u32 2147483647, %v348_v26  ;;  %vm354_vm4 = vweird.f32 %v348_v26 }
 0x1c4   : > { %v361_v34 = vor.u32 1.1754944e-38, %v360_v30  ;;  %vm359_vm6 = vcmp.eq.f32.partialorder %v358_v32, 8.507059e+37 }
 0x1c8   : > { %v596_v27 = vpop.eup %595 }
 0x1c9   : > { %v350_v28 = vmul.f32 %v596_v27, %v348_v26  ;;  %vm355_vm3 = vweird.f32 %v596_v27 }
 0x1ca   : > { %vm356_vm5 = vmor %vm354_vm4, %vm355_vm3 }
 0x1cb   : > { %v351_v29 = vsub.f32 1.0, %v350_v28 }
 0x1cd   : > { %v352_v31 = vmul.f32 %v596_v27, %v351_v29 }
 0x1cf   : > { %v353_v33 = vadd.f32 %v596_v27, %v352_v31 }
 0x1d1   : > { %v357_v35 = vsel %vm356_vm5, %v596_v27, %v353_v33 }
 0x1d2   : > { %v362_v36 = vsel %vm359_vm6, %v361_v34, %v357_v35 }
 0x1d3   : > { %v364_v37 = vperm.slane %v362_v36, 0 }
 0x1d5   : > { %369 = vperm.xlu0 %590, %v364_v37  }
 0x1dd   : > { %592 = vset.pattern.permute.xlu0 %v381_v14 }
 0x229   : > { %v384_v41 = vpop.permute.xlu1 %383 }
 0x22a   : > { %v389_v44 = vperm.slane %v384_v41, %v374_v40 }
 0x247   : > { %v370_v42 = vpop.permute.xlu0 %369 }
 0x248   : > { %v375_v43 = vperm.slane %v370_v42, %v374_v40 }
 0x24a   : > { %v377_v45 = vmul.f32 %v375_v43, %v902_v0 }
 0x24c   : > { %v391_v46 = vadd.f32 %v389_v44, %v377_v45 }
 0x24e   : > { %392 = vst [vmem:[%s271_s23] sm:$0xff] %v391_v46 }
 0x24f   : > { %714 = shalt.err (!%p711_p11)
}
 0x250   : > { %532 = dma.vmem_to_hbm [thread:$0]  (%p858_p3), %s408_s26, 128, %s410_s27, %s394_s22  }
 0x251 PF: > { %s421_s17 = sand.u32 1, %s745_s18   ;;  %p958_p12 = scmp.ge.s32.totalorder %s757_s21, 2 }
 0x252   : > { %s422_s8 = scalar_lea.sflag [#allocation4], %s421_s17 }
 0x253   : > { %p546_p13 = pnand %p958_p12, %p827_p6 }
 0x255   : > { %p547_p0 = pneg %p546_p13 }
 0x257   : > { %740 = dma.done.wait (%p547_p0), %s422_s8, 128  }
 0x258   : > { %742 = vsyncadd (%p547_p0), %s422_s8, 4294967168  ;;  %p19_p5 = scmp.ge.s32.totalorder %s848_s12, 4   ;;  %s959_s18 = smov %s749_s19 }
 0x259   : > { %s960_s19 = smov %s753_s20  ;;  %s961_s20 = smov %s864_s16 }
 0x25a   : > { %s962_s21 = smov %s848_s12  ;;  %21 = sbr.rel (!%p19_p5) target bundleno = 6 (0x6), region = 93 }
 0x25f   :  { %428 = vsyncpa [#allocation3], 1 }
 0x260   :  { %430 = vsyncpa [#allocation3 + $0x1], 1 }
 0x261   :  { %431 = vsyncpa [#allocation6], 1 }
 0x262   :  { %432 = vsyncpa [#allocation4], 1 }
 0x263   :  { %434 = vsyncpa [#allocation4 + $0x1], 1 }

</bundles_post_ra>
